<compile_context>
chip_gen: v7x
topology: tpu7x:2x2x1
jax: 0.10.0
libtpu: 0.0.40
codegen_flags: <defaults>
</compile_context>

<pallas_src>
import functools

import jax
import jax.numpy as jnp
from jax.experimental import pallas as pl
from jax.experimental.pallas import tpu as pltpu

NEG_SLOPE = 0.01   # nn.LeakyReLU default negative_slope
LANE = 128         # output / activation lane width (keeps every store unmasked)
SUBLANE = 8


def _round_up(x, m):
    return ((x + m - 1) // m) * m


def _leaky_relu(x):
    return jnp.where(x > 0, x, NEG_SLOPE * x)


def _softplus(x):
    # Matches F.softplus(x, beta=1) (PyTorch threshold=20).
    return jnp.where(x > 20.0, x, jnp.log1p(jnp.exp(jnp.minimum(x, 20.0))))


# Packed layer order (A1 and C1 are fused into one matmul at pack time).
_L_COMMON, _L_A1C1, _L_A2, _L_RES, _L_C2 = range(5)
_NUM_LAYERS = 5


def _actor_critic_kernel(num_actions, kpad,
                         std_ref,     # SMEM (1,) f32
                         state_ref,   # VMEM (TM, LANE) f32, zero-padded states
                         w_ref,       # VMEM (5, kpad, LANE) f32, resident weights
                         b_ref,       # VMEM (5, 1, LANE) f32, resident biases
                         out_ref):    # VMEM (TM, LANE) f32 lane-packed output
    x = state_ref[...]                                        # (TM, LANE)
    std_bias = std_ref[0]

    def linear(inp, layer):
        return (jnp.dot(inp[:, :kpad], w_ref[layer],
                        preferred_element_type=jnp.float32) + b_ref[layer])

    # common = LeakyReLU(Linear(state))          -- lanes [0, hidden), rest 0
    common = _leaky_relu(linear(x, _L_COMMON))

    # Fused actor-hidden / critic1: lanes [0,h2)=h_a, [h2,2h2)=c1 (LeakyReLU'd).
    h_ac = _leaky_relu(linear(common, _L_A1C1))

    # policy = Linear(h_a): rows >= h2 of W_A2 are zero, so the c1 lanes of
    # h_ac contribute nothing.  Lanes [0,A)=mu, [A,2A)=sigma_pre, rest 0.
    policy = linear(h_ac, _L_A2)

    # residual(mu): rows >= A of W_RES are zero (kills the sigma lanes); output
    # columns live in [h2,2h2) so they line up with c1 with no shuffle.
    res = _leaky_relu(linear(policy, _L_RES))

    # fused lanes [h2,2h2) = relu(c1 + res); lanes [0,h2) hold relu(h_a) but
    # the corresponding W_C2 rows are zero so they never reach the value.
    fused = jnp.maximum(h_ac + res, 0.0)
    value_vec = linear(fused, _L_C2)                # nonzero only at lane 2A

    # Lane-packed output: [0,A)=mu, [A,2A)=sigma, lane 2A=value, 2A+1=nan flag.
    lane = jax.lax.broadcasted_iota(jnp.int32, x.shape, 1)
    sigma = _softplus(policy - std_bias)
    packed = jnp.where(lane < num_actions, policy,
                       jnp.where(lane < 2 * num_actions, sigma, 0.0))
    packed = packed + value_vec                     # value lands in lane 2A

    # TODO(synk): PyTorch raises on NaN; no in-kernel raise exists, so emit a
    # per-row flag (covers mu, sigma AND value) that the wrapper surfaces.
    row_nan = jnp.any(jnp.isnan(packed), axis=-1, keepdims=True).astype(jnp.float32)
    packed = jnp.where(lane == 2 * num_actions + 1, row_nan, packed)

    out_ref[...] = packed


def pack_params(params, num_inputs, num_actions, hidden):
    """Pack the 12 Linear tensors into two padded buffers (done once at init)."""
    h2 = hidden // 2
    kpad = _round_up(max(num_inputs, hidden, 2 * h2, num_actions), SUBLANE)
    assert 2 * num_actions + 2 <= LANE
    assert hidden <= LANE and 2 * h2 <= LANE and 2 * h2 <= kpad

    W = jnp.zeros((_NUM_LAYERS, kpad, LANE), jnp.float32)
    B = jnp.zeros((_NUM_LAYERS, 1, LANE), jnp.float32)

    def put(W, B, layer, w, b, row_off=0, col_off=0):
        fi, fo = w.shape
        W = W.at[layer, row_off:row_off + fi, col_off:col_off + fo].set(
            w.astype(jnp.float32))
        B = B.at[layer, 0, col_off:col_off + fo].set(
            jnp.reshape(b, (-1,)).astype(jnp.float32))
        return W, B

    W, B = put(W, B, _L_COMMON, params["w_common"], params["b_common"])
    W, B = put(W, B, _L_A1C1, params["w_a1"], params["b_a1"])               # cols [0,h2)
    W, B = put(W, B, _L_A1C1, params["w_c1"], params["b_c1"], col_off=h2)   # cols [h2,2h2)
    W, B = put(W, B, _L_A2, params["w_a2"], params["b_a2"])                 # rows [0,h2)
    W, B = put(W, B, _L_RES, params["w_r"], params["b_r"], col_off=h2)      # rows [0,A), cols [h2,2h2)
    W, B = put(W, B, _L_C2, params["w_c2"], params["b_c2"],
               row_off=h2, col_off=2 * num_actions)                         # value -> lane 2A
    return {"W": W, "B": B, "kpad": kpad, "num_actions": num_actions,
            "num_inputs": num_inputs, "hidden": hidden}


def split_gaussian_actor_critic(state, packed, std_bias):
    """state: (num_inputs,) or (N, num_inputs) of independent states.

    Returns (value, stack((mu, sigma)), nan_flag):
      single state:  value (1,1),  mu_sigma (2,1,A)   (matches the PyTorch module)
      batched:       value (N,1),  mu_sigma (2,N,A)   (row-wise, bit-identical per state)
    """
    num_actions = packed["num_actions"]
    num_inputs = packed["num_inputs"]
    kpad = packed["kpad"]
    W, B = packed["W"], packed["B"]
    nl = W.shape[0]

    single = state.ndim == 1
    states = state[None, :] if single else state
    n = states.shape[0]

    # Row tile: multiple of 8 sublanes, capped at the 128-row MXU height.
    tm = min(_round_up(n, SUBLANE), 128)
    n_pad = _round_up(n, tm)
    grid = (n_pad // tm,)

    state_pad = jnp.zeros((n_pad, LANE), jnp.float32)
    state_pad = state_pad.at[:n, :num_inputs].set(states.astype(jnp.float32))
    std_arr = jnp.reshape(jnp.asarray(std_bias, jnp.float32), (1,))

    flops = int(2 * nl * kpad * LANE * n_pad)
    bytes_accessed = int(4 * (W.size + B.size + 2 * n_pad * LANE) + 4)

    out = pl.pallas_call(
        functools.partial(_actor_critic_kernel, num_actions, kpad),
        out_shape=jax.ShapeDtypeStruct((n_pad, LANE), jnp.float32),
        grid=grid,
        in_specs=[
            # Runtime std_bias scalar (no recompile when it anneals).
            pl.BlockSpec((1,), lambda i: (0,),
                         memory_space=pltpu.MemorySpace.SMEM),
            # State tiles are pipelined across the batch grid.
            pl.BlockSpec((tm, LANE), lambda i: (i, 0)),
            # Weights / biases: constant index_map -> DMA'd once, stay resident.
            pl.BlockSpec((nl, kpad, LANE), lambda i: (0, 0, 0)),
            pl.BlockSpec((nl, 1, LANE), lambda i: (0, 0, 0)),
        ],
        out_specs=pl.BlockSpec((tm, LANE), lambda i: (i, 0)),
        compiler_params=pltpu.CompilerParams(
            dimension_semantics=("parallel",)),
        cost_estimate=pl.CostEstimate(
            flops=flops,
            transcendentals=int(n_pad * LANE),
            bytes_accessed=bytes_accessed),
    )(std_arr, state_pad, W, B)

    mu = out[:n, :num_actions]                              # (N, A)
    sigma = out[:n, num_actions:2 * num_actions]            # (N, A)
    value = out[:n, 2 * num_actions:2 * num_actions + 1]    # (N, 1)
    nan_flag = jnp.any(out[:n, 2 * num_actions + 1] > 0.0)
    return value, jnp.stack((mu, sigma)), nan_flag


def _reference(states, params, std_bias):
    x = jnp.atleast_2d(states).astype(jnp.float32)
    common = _leaky_relu(x @ params["w_common"] + params["b_common"])
    h_a = _leaky_relu(common @ params["w_a1"] + params["b_a1"])
    policy = h_a @ params["w_a2"] + params["b_a2"]
    a = policy.shape[-1] // 2
    mu, sig = policy[:, :a], policy[:, a:]
    c1 = _leaky_relu(common @ params["w_c1"] + params["b_c1"])
    res = _leaky_relu(mu @ params["w_r"] + params["b_r"])
    value = jnp.maximum(c1 + res, 0.0) @ params["w_c2"] + params["b_c2"]
    sig = _softplus(sig - std_bias)
    return value, jnp.stack((mu, sig))


def _init_params(key, num_inputs, num_actions, hidden):
    h2 = hidden // 2
    ks = jax.random.split(key, 12)

    def lin(kw, kb, fan_in, fan_out):
        scale = 1.0 / jnp.sqrt(jnp.float32(fan_in))
        w = jax.random.uniform(kw, (fan_in, fan_out), jnp.float32, -scale, scale)
        b = jax.random.uniform(kb, (1, fan_out), jnp.float32, -scale, scale)
        return w, b

    p = {}
    p["w_common"], p["b_common"] = lin(ks[0], ks[1], num_inputs, hidden)
    p["w_a1"], p["b_a1"] = lin(ks[2], ks[3], hidden, h2)
    p["w_a2"], p["b_a2"] = lin(ks[4], ks[5], h2, num_actions * 2)
    p["w_c1"], p["b_c1"] = lin(ks[6], ks[7], hidden, h2)
    p["w_c2"], p["b_c2"] = lin(ks[8], ks[9], h2, 1)
    p["w_r"], p["b_r"] = lin(ks[10], ks[11], num_actions, h2)
    return p


if __name__ == "__main__":
    num_inputs, num_actions, hidden_size = 16, 8, 32
    std_bias = 0.5
    batch = 8

    key = jax.random.PRNGKey(0)
    k_param, k_state = jax.random.split(key)
    params = _init_params(k_param, num_inputs, num_actions, hidden_size)
    packed = pack_params(params, num_inputs, num_actions, hidden_size)

    # Batched path: independent states share one resident weight DMA.
    states = jax.random.normal(k_state, (batch, num_inputs), jnp.float32)
    value, mu_sigma, nan_flag = split_gaussian_actor_critic(states, packed, std_bias)
    jax.block_until_ready((value, mu_sigma, nan_flag))

    ref_value, ref_mu_sigma = _reference(states, params, std_bias)
    assert value.shape == (batch, 1)
    assert mu_sigma.shape == (2, batch, num_actions)
    assert not bool(nan_flag)
    assert jnp.allclose(value, ref_value, rtol=1e-3, atol=1e-3)
    assert jnp.allclose(mu_sigma, ref_mu_sigma, rtol=1e-3, atol=1e-3)

    # Single-state path matches the PyTorch module's (1,1) / (2,1,A) shapes.
    value1, mu_sigma1, nan_flag1 = split_gaussian_actor_critic(
        states[0], packed, std_bias)
    jax.block_until_ready((value1, mu_sigma1, nan_flag1))
    assert value1.shape == (1, 1)
    assert mu_sigma1.shape == (2, 1, num_actions)
    assert not bool(nan_flag1)
    assert jnp.allclose(value1, ref_value[:1], rtol=1e-3, atol=1e-3)
    assert jnp.allclose(mu_sigma1, ref_mu_sigma[:, :1], rtol=1e-3, atol=1e-3)

    print("KERNEL_OK")
</pallas_src>

<mosaic_0001>
module attributes {stable_mosaic.version = 11 : i64} {
  func.func @_actor_critic_kernel(%arg0: i32, %arg1: memref<1xf32, #tpu.memory_space<smem>>, %arg2: memref<8x128xf32, #tpu.memory_space<vmem>>, %arg3: memref<5x32x128xf32, #tpu.memory_space<vmem>>, %arg4: memref<5x1x128xf32, #tpu.memory_space<vmem>>, %arg5: memref<8x128xf32, #tpu.memory_space<vmem>>) attributes {dimension_semantics = [#tpu.dimension_semantics<parallel>], iteration_bounds = array<i64: 1>, scalar_prefetch = 0 : i64, scratch_operands = 0 : i64, tpu.core_type = #tpu.core_type<tc>, window_params = [{transform_indices = @transform_0, window_bounds = array<i64: 1>}, {transform_indices = @transform_1, window_bounds = array<i64: 8, 128>}, {pipeline_mode = #tpu.pipeline_mode<synchronous>, transform_indices = @transform_2, window_bounds = array<i64: 5, 32, 128>}, {pipeline_mode = #tpu.pipeline_mode<synchronous>, transform_indices = @transform_3, window_bounds = array<i64: 5, 1, 128>}, {transform_indices = @transform_4, window_bounds = array<i64: 8, 128>}]} {
    %c0 = arith.constant 0 : index
    %c0_0 = arith.constant 0 : index
    %0 = vector.load %arg2[%c0, %c0_0] : memref<8x128xf32, #tpu.memory_space<vmem>>, vector<8x128xf32>
    %c0_1 = arith.constant 0 : index
    %1 = memref.load %arg1[%c0_1] : memref<1xf32, #tpu.memory_space<smem>>
    %2 = vector.extract_strided_slice %0 {offsets = [0, 0], sizes = [8, 32], strides = [1, 1]} : vector<8x128xf32> to vector<8x32xf32>
    %c0_2 = arith.constant 0 : index
    %c0_3 = arith.constant 0 : index
    %c0_4 = arith.constant 0 : index
    %3 = vector.load %arg3[%c0_2, %c0_3, %c0_4] : memref<5x32x128xf32, #tpu.memory_space<vmem>>, vector<1x32x128xf32>
    %4 = vector.shape_cast %3 : vector<1x32x128xf32> to vector<32x128xf32>
    %cst = arith.constant dense<0.000000e+00> : vector<8x128xf32>
    %5 = tpu.matmul %2, %4, %cst {dimension_numbers = #tpu.dot_dimension_numbers<[1], [0], [0], [1], [0, 0, 1, 1], [], []>} : vector<8x32xf32>, vector<32x128xf32>, vector<8x128xf32> -> vector<8x128xf32>
    %c0_5 = arith.constant 0 : index
    %c0_6 = arith.constant 0 : index
    %c0_7 = arith.constant 0 : index
    %6 = vector.load %arg4[%c0_5, %c0_6, %c0_7] : memref<5x1x128xf32, #tpu.memory_space<vmem>>, vector<1x1x128xf32>
    %7 = vector.shape_cast %6 : vector<1x1x128xf32> to vector<1x128xf32>
    %8 = vector.broadcast %7 : vector<1x128xf32> to vector<8x128xf32>
    %9 = arith.addf %5, %8 : vector<8x128xf32>
    %cst_8 = arith.constant 0.000000e+00 : f32
    %10 = vector.broadcast %cst_8 : f32 to vector<8x128xf32>
    %11 = arith.cmpf ogt, %9, %10 : vector<8x128xf32>
    %cst_9 = arith.constant 0.00999999977 : f32
    %12 = vector.broadcast %cst_9 : f32 to vector<8x128xf32>
    %13 = arith.mulf %12, %9 : vector<8x128xf32>
    %14 = arith.select %11, %9, %13 : vector<8x128xi1>, vector<8x128xf32>
    %15 = vector.extract_strided_slice %14 {offsets = [0, 0], sizes = [8, 32], strides = [1, 1]} : vector<8x128xf32> to vector<8x32xf32>
    %c1 = arith.constant 1 : index
    %c0_10 = arith.constant 0 : index
    %c0_11 = arith.constant 0 : index
    %16 = vector.load %arg3[%c1, %c0_10, %c0_11] : memref<5x32x128xf32, #tpu.memory_space<vmem>>, vector<1x32x128xf32>
    %17 = vector.shape_cast %16 : vector<1x32x128xf32> to vector<32x128xf32>
    %cst_12 = arith.constant dense<0.000000e+00> : vector<8x128xf32>
    %18 = tpu.matmul %15, %17, %cst_12 {dimension_numbers = #tpu.dot_dimension_numbers<[1], [0], [0], [1], [0, 0, 1, 1], [], []>} : vector<8x32xf32>, vector<32x128xf32>, vector<8x128xf32> -> vector<8x128xf32>
    %c1_13 = arith.constant 1 : index
    %c0_14 = arith.constant 0 : index
    %c0_15 = arith.constant 0 : index
    %19 = vector.load %arg4[%c1_13, %c0_14, %c0_15] : memref<5x1x128xf32, #tpu.memory_space<vmem>>, vector<1x1x128xf32>
    %20 = vector.shape_cast %19 : vector<1x1x128xf32> to vector<1x128xf32>
    %21 = vector.broadcast %20 : vector<1x128xf32> to vector<8x128xf32>
    %22 = arith.addf %18, %21 : vector<8x128xf32>
    %cst_16 = arith.constant 0.000000e+00 : f32
    %23 = vector.broadcast %cst_16 : f32 to vector<8x128xf32>
    %24 = arith.cmpf ogt, %22, %23 : vector<8x128xf32>
    %cst_17 = arith.constant 0.00999999977 : f32
    %25 = vector.broadcast %cst_17 : f32 to vector<8x128xf32>
    %26 = arith.mulf %25, %22 : vector<8x128xf32>
    %27 = arith.select %24, %22, %26 : vector<8x128xi1>, vector<8x128xf32>
    %28 = vector.extract_strided_slice %27 {offsets = [0, 0], sizes = [8, 32], strides = [1, 1]} : vector<8x128xf32> to vector<8x32xf32>
    %c2 = arith.constant 2 : index
    %c0_18 = arith.constant 0 : index
    %c0_19 = arith.constant 0 : index
    %29 = vector.load %arg3[%c2, %c0_18, %c0_19] : memref<5x32x128xf32, #tpu.memory_space<vmem>>, vector<1x32x128xf32>
    %30 = vector.shape_cast %29 : vector<1x32x128xf32> to vector<32x128xf32>
    %cst_20 = arith.constant dense<0.000000e+00> : vector<8x128xf32>
    %31 = tpu.matmul %28, %30, %cst_20 {dimension_numbers = #tpu.dot_dimension_numbers<[1], [0], [0], [1], [0, 0, 1, 1], [], []>} : vector<8x32xf32>, vector<32x128xf32>, vector<8x128xf32> -> vector<8x128xf32>
    %c2_21 = arith.constant 2 : index
    %c0_22 = arith.constant 0 : index
    %c0_23 = arith.constant 0 : index
    %32 = vector.load %arg4[%c2_21, %c0_22, %c0_23] : memref<5x1x128xf32, #tpu.memory_space<vmem>>, vector<1x1x128xf32>
    %33 = vector.shape_cast %32 : vector<1x1x128xf32> to vector<1x128xf32>
    %34 = vector.broadcast %33 : vector<1x128xf32> to vector<8x128xf32>
    %35 = arith.addf %31, %34 : vector<8x128xf32>
    %36 = vector.extract_strided_slice %35 {offsets = [0, 0], sizes = [8, 32], strides = [1, 1]} : vector<8x128xf32> to vector<8x32xf32>
    %c3 = arith.constant 3 : index
    %c0_24 = arith.constant 0 : index
    %c0_25 = arith.constant 0 : index
    %37 = vector.load %arg3[%c3, %c0_24, %c0_25] : memref<5x32x128xf32, #tpu.memory_space<vmem>>, vector<1x32x128xf32>
    %38 = vector.shape_cast %37 : vector<1x32x128xf32> to vector<32x128xf32>
    %cst_26 = arith.constant dense<0.000000e+00> : vector<8x128xf32>
    %39 = tpu.matmul %36, %38, %cst_26 {dimension_numbers = #tpu.dot_dimension_numbers<[1], [0], [0], [1], [0, 0, 1, 1], [], []>} : vector<8x32xf32>, vector<32x128xf32>, vector<8x128xf32> -> vector<8x128xf32>
    %c3_27 = arith.constant 3 : index
    %c0_28 = arith.constant 0 : index
    %c0_29 = arith.constant 0 : index
    %40 = vector.load %arg4[%c3_27, %c0_28, %c0_29] : memref<5x1x128xf32, #tpu.memory_space<vmem>>, vector<1x1x128xf32>
    %41 = vector.shape_cast %40 : vector<1x1x128xf32> to vector<1x128xf32>
    %42 = vector.broadcast %41 : vector<1x128xf32> to vector<8x128xf32>
    %43 = arith.addf %39, %42 : vector<8x128xf32>
    %cst_30 = arith.constant 0.000000e+00 : f32
    %44 = vector.broadcast %cst_30 : f32 to vector<8x128xf32>
    %45 = arith.cmpf ogt, %43, %44 : vector<8x128xf32>
    %cst_31 = arith.constant 0.00999999977 : f32
    %46 = vector.broadcast %cst_31 : f32 to vector<8x128xf32>
    %47 = arith.mulf %46, %43 : vector<8x128xf32>
    %48 = arith.select %45, %43, %47 : vector<8x128xi1>, vector<8x128xf32>
    %49 = arith.addf %27, %48 : vector<8x128xf32>
    %cst_32 = arith.constant 0.000000e+00 : f32
    %50 = vector.broadcast %cst_32 : f32 to vector<8x128xf32>
    %51 = arith.maximumf %49, %50 : vector<8x128xf32>
    %52 = vector.extract_strided_slice %51 {offsets = [0, 0], sizes = [8, 32], strides = [1, 1]} : vector<8x128xf32> to vector<8x32xf32>
    %c4 = arith.constant 4 : index
    %c0_33 = arith.constant 0 : index
    %c0_34 = arith.constant 0 : index
    %53 = vector.load %arg3[%c4, %c0_33, %c0_34] : memref<5x32x128xf32, #tpu.memory_space<vmem>>, vector<1x32x128xf32>
    %54 = vector.shape_cast %53 : vector<1x32x128xf32> to vector<32x128xf32>
    %cst_35 = arith.constant dense<0.000000e+00> : vector<8x128xf32>
    %55 = tpu.matmul %52, %54, %cst_35 {dimension_numbers = #tpu.dot_dimension_numbers<[1], [0], [0], [1], [0, 0, 1, 1], [], []>} : vector<8x32xf32>, vector<32x128xf32>, vector<8x128xf32> -> vector<8x128xf32>
    %c4_36 = arith.constant 4 : index
    %c0_37 = arith.constant 0 : index
    %c0_38 = arith.constant 0 : index
    %56 = vector.load %arg4[%c4_36, %c0_37, %c0_38] : memref<5x1x128xf32, #tpu.memory_space<vmem>>, vector<1x1x128xf32>
    %57 = vector.shape_cast %56 : vector<1x1x128xf32> to vector<1x128xf32>
    %58 = vector.broadcast %57 : vector<1x128xf32> to vector<8x128xf32>
    %59 = arith.addf %55, %58 : vector<8x128xf32>
    %60 = tpu.iota {dimensions = array<i32: 1>} : vector<8x128xi32>
    %61 = vector.broadcast %1 : f32 to vector<8x128xf32>
    %62 = arith.subf %35, %61 : vector<8x128xf32>
    %cst_39 = arith.constant 2.000000e+01 : f32
    %63 = vector.broadcast %cst_39 : f32 to vector<8x128xf32>
    %64 = arith.cmpf ogt, %62, %63 : vector<8x128xf32>
    %cst_40 = arith.constant 2.000000e+01 : f32
    %65 = vector.broadcast %cst_40 : f32 to vector<8x128xf32>
    %66 = arith.minimumf %62, %65 : vector<8x128xf32>
    %67 = math.exp %66 : vector<8x128xf32>
    %68 = math.log1p %67 : vector<8x128xf32>
    %69 = arith.select %64, %62, %68 : vector<8x128xi1>, vector<8x128xf32>
    %c8_i32 = arith.constant 8 : i32
    %70 = vector.broadcast %c8_i32 : i32 to vector<8x128xi32>
    %71 = arith.cmpi slt, %60, %70 : vector<8x128xi32>
    %c16_i32 = arith.constant 16 : i32
    %72 = vector.broadcast %c16_i32 : i32 to vector<8x128xi32>
    %73 = arith.cmpi slt, %60, %72 : vector<8x128xi32>
    %cst_41 = arith.constant 0.000000e+00 : f32
    %74 = vector.broadcast %cst_41 : f32 to vector<8x128xf32>
    %75 = arith.select %73, %69, %74 : vector<8x128xi1>, vector<8x128xf32>
    %76 = arith.select %71, %35, %75 : vector<8x128xi1>, vector<8x128xf32>
    %77 = arith.addf %76, %59 : vector<8x128xf32>
    %78 = arith.cmpf one, %77, %77 : vector<8x128xf32>
    %cst_42 = arith.constant 1.000000e+00 : f32
    %cst_43 = arith.constant 0.000000e+00 : f32
    %79 = vector.broadcast %cst_42 : f32 to vector<8x128xf32>
    %80 = vector.broadcast %cst_43 : f32 to vector<8x128xf32>
    %81 = arith.select %78, %79, %80 : vector<8x128xi1>, vector<8x128xf32>
    %cst_44 = arith.constant dense<0xFF800000> : vector<8xf32>
    %82 = vector.multi_reduction <maximumf>, %81, %cst_44 [1] : vector<8x128xf32> to vector<8xf32>
    %cst_45 = arith.constant 0.000000e+00 : f32
    %83 = vector.broadcast %cst_45 : f32 to vector<8xf32>
    %84 = arith.cmpf ogt, %82, %83 : vector<8xf32>
    %85 = vector.shape_cast %84 : vector<8xi1> to vector<8x1xi1>
    %86 = arith.extui %85 : vector<8x1xi1> to vector<8x1xi32>
    %87 = arith.sitofp %86 : vector<8x1xi32> to vector<8x1xf32>
    %c17_i32 = arith.constant 17 : i32
    %88 = vector.broadcast %c17_i32 : i32 to vector<8x128xi32>
    %89 = arith.cmpi eq, %60, %88 : vector<8x128xi32>
    %90 = vector.shape_cast %87 : vector<8x1xf32> to vector<8x1xf32>
    %91 = vector.broadcast %90 : vector<8x1xf32> to vector<8x128xf32>
    %92 = arith.select %89, %91, %77 : vector<8x128xi1>, vector<8x128xf32>
    %c0_46 = arith.constant 0 : index
    %c0_47 = arith.constant 0 : index
    %93 = vector.load %arg5[%c0_46, %c0_47] : memref<8x128xf32, #tpu.memory_space<vmem>>, vector<8x128xf32>
    tpu.vector_store %arg5[%c0_46, %c0_47], %92 {strides = array<i32>} : memref<8x128xf32, #tpu.memory_space<vmem>>, vector<8x128xf32>,
    return
  }
  func.func @transform_0(%arg0: i32) -> i32 {
    %c0_i32 = arith.constant 0 : i32
    %c0_i32_0 = arith.constant 0 : i32
    return %c0_i32 : i32
  }
  func.func @transform_1(%arg0: i32) -> (i32, i32) {
    %c0_i32 = arith.constant 0 : i32
    %c0_i32_0 = arith.constant 0 : i32
    return %arg0, %c0_i32 : i32, i32
  }
  func.func @transform_2(%arg0: i32) -> (i32, i32, i32) {
    %c0_i32 = arith.constant 0 : i32
    %c0_i32_0 = arith.constant 0 : i32
    %c0_i32_1 = arith.constant 0 : i32
    %c0_i32_2 = arith.constant 0 : i32
    return %c0_i32, %c0_i32_0, %c0_i32_1 : i32, i32, i32
  }
  func.func @transform_3(%arg0: i32) -> (i32, i32, i32) {
    %c0_i32 = arith.constant 0 : i32
    %c0_i32_0 = arith.constant 0 : i32
    %c0_i32_1 = arith.constant 0 : i32
    %c0_i32_2 = arith.constant 0 : i32
    return %c0_i32, %c0_i32_0, %c0_i32_1 : i32, i32, i32
  }
  func.func @transform_4(%arg0: i32) -> (i32, i32) {
    %c0_i32 = arith.constant 0 : i32
    %c0_i32_0 = arith.constant 0 : i32
    return %arg0, %c0_i32 : i32, i32
  }
}

</mosaic_0001>

<bundles_post_ra>
// kernel: tpu_custom_call.1
= control target key start
LH: loop header
LB: loop body
LE: loop exit
PB: predicated region body
PF: predicated region fallthrough
CT: control target
= control target key end

     0   :  { %10 = vsyncpa [#allocation4], 0  ;;  %s866_s0 = inlined_call_operand.<no memory space> [shape: f32[1], index: 0, kind: input, shape index: {}]   ;;  %s867_s1 = inlined_call_operand.hbm [shape: f32[8,128], index: 1, kind: input, shape index: {}]   ;;  %s868_s2 = inlined_call_operand.hbm [shape: f32[5,32,128], index: 2, kind: input, shape index: {}]   ;;  %s869_s3 = inlined_call_operand.vmem [shape: f32[5,1,128], index: 3, kind: input, shape index: {}]   ;;  %s870_s4 = inlined_call_operand.hbm [shape: f32[8,128], index: 4, kind: output, shape index: {}]  }
   0x1   :  { %11 = vsyncpa [#allocation7], 0 }
   0x2   :  { %12 = vsyncpa [#allocation5], 0  ;;  %s745_s15 = smov [#allocation3]   ;;  %s746_s17 = smov [#allocation6]  }
   0x3   :  { %s21_s16 = sshll.u32 %s745_s15, 4  ;;  %s30_s18 = sshll.u32 %s746_s17, 4  ;;  %s22_s16 = int_to_ptr.vmem [resolvable:$true] %s21_s16  ;;  %s778_s18 = int_to_ptr.vmem [resolvable:$true] %s30_s18 }
   0x4   :  { %s673_s21 = scalar_lea.hbm %s867_s1, 128 }
   0x5   :  { %p674_p0 = scmp.ne.s32.totalorder %s867_s1, %s673_s21  ;;  %p677_p1 = scmp.lt.u32.totalorder %s673_s21, %s867_s1 }
   0x7   :  { %p679_p2 = pnand %p677_p1, %p674_p0 }
   0x9   :  { %682 = shalt.err (!%p679_p2)
}
   0xa   :  { %s683_s26 = scalar_lea.vmem %s22_s16, 128  ;;  %p688_p4 = scmp.lt.s32.totalorder %s22_s16, %s22_s16 }
   0xb   :  { %p684_p3 = scmp.ne.s32.totalorder %s22_s16, %s683_s26  ;;  %p689_p5 = scmp.lt.s32.totalorder %s683_s26, %s683_s26 }
   0xd   :  { %p690_p6 = por %p689_p5, %p688_p4 }
   0xf   :  { %p691_p7 = pnand %p690_p6, %p684_p3 }
  0x11   :  { %694 = shalt.err (!%p691_p7)
}
  0x12   :  { %24 = dma.hbm_to_vmem [thread:$0]  %s867_s1, 128, %s22_s16, [#allocation4]  }
  0x13   :  { %s695_s5 = scalar_lea.hbm %s868_s2, 2560 }
  0x14   :  { %p696_p8 = scmp.ne.s32.totalorder %s868_s2, %s695_s5  ;;  %p699_p9 = scmp.lt.u32.totalorder %s695_s5, %s868_s2 }
  0x16   :  { %p701_p10 = pnand %p699_p9, %p696_p8 }
  0x18   :  { %704 = shalt.err (!%p701_p10)
}
  0x19   :  { %s705_s10 = scalar_lea.vmem %s778_s18, 2560  ;;  %p710_p12 = scmp.lt.s32.totalorder %s778_s18, %s778_s18 }
  0x1a   :  { %p706_p11 = scmp.ne.s32.totalorder %s778_s18, %s705_s10  ;;  %p711_p13 = scmp.lt.s32.totalorder %s705_s10, %s705_s10 }
  0x1c   :  { %p712_p0 = por %p711_p13, %p710_p12 }
  0x1e   :  { %p713_p1 = pnand %p712_p0, %p706_p11 }
  0x20   :  { %716 = shalt.err (!%p713_p1)
}
  0x21   :  { %s747_s1 = smov 128   ;;  %s748_s11 = smov 8  }
  0x22   :  { %36 = dma.hbm_to_vmem [thread:$0]  %s868_s2, 2560, %s778_s18, [#allocation7], %s747_s1, %s747_s1, %s748_s11  }
  0x23   :  { %739 = dma.done.wait [#allocation4], 128  }
  0x24   :  { %740 = vsyncadd [#allocation4], 4294967168 }
  0x25   :  { %741 = dma.done.wait [#allocation7], 2560  }
  0x26   :  { %742 = vsyncadd [#allocation7], 4294964736  ;;  %v749_v0 = vmov 0.0|0.0   ;;  %vm750_vm0 = vmmov 0   ;;  %v751_v1 = vmov 0.0   ;;  %v47_v2 = vld [vmem:[#allocation6] sm:$0xff]  ;;  %v489_v57 = vstv %s866_s0 }
  0x27   :  { %631 = vmatprep.subr.bf16.mxu0 %v749_v0  ;;  %584 = vmatprep.mubr.msk.f32.mxu0 %vm750_vm0, %v751_v1  ;;  %v48_v3 = vld [vmem:[#allocation6 + $0x8] sm:$0xff]  ;;  %v49_v4 = vld [vmem:[#allocation6 + $0x10] sm:$0xff]  ;;  %v50_v6 = vld [vmem:[#allocation6 + $0x18] sm:$0xff]  ;;  %vm58_vm1 = vcmask 261120   ;;  %s752_s24 = smov [#allocation8]  }
  0x28   :  { %637 = vmatprep.subr.bf16.mxu1 %v749_v0  ;;  %595 = vmatprep.mubr.msk.f32.mxu1 %vm750_vm0, %v751_v1  ;;  %v632_v5 = vpack.c.bf16 %v48_v3, %v47_v2  ;;  %v136_v7 = vld [vmem:[#allocation6 + $0x20] sm:$0xff]  ;;  %v137_v8 = vld [vmem:[#allocation6 + $0x28] sm:$0xff]  ;;  %v635_v9 = vpack.c.bf16 %v50_v6, %v49_v4  ;;  %v45_v11 = vld [vmem:[#allocation3] sm:$0xff]  ;;  %v487_v3 = vlaneseq  ;;  %s526_s25 = sshll.u32 %s752_s24, 4  ;;  %s527_s25 = int_to_ptr.vmem [resolvable:$true] %s526_s25 }
  0x29   :  { %v638_v10 = vpack.c.bf16 %v137_v8, %v136_v7  ;;  %v138_v12 = vld [vmem:[#allocation6 + $0x30] sm:$0xff]  ;;  %v139_v13 = vld [vmem:[#allocation6 + $0x38] sm:$0xff]  ;;  %v225_v15 = vld [vmem:[#allocation6 + $0x40] sm:$0xff]  ;;  %p722_p3 = scmp.lt.s32.totalorder %s527_s25, %s527_s25 }
  0x2a   :  { %633 = vmatpush3.bf16.msra.mxu0 %v632_v5  ;;  %v641_v14 = vpack.c.bf16 %v139_v13, %v138_v12  ;;  %v226_v16 = vld [vmem:[#allocation6 + $0x48] sm:$0xff]  ;;  %v536_v18 = vld [vmem:[%s869_s3] ss:$0 sm:$0xff]  ;;  %v227_v24 = vld [vmem:[#allocation6 + $0x50] sm:$0xff]  ;;  %v488_v7 = vand.u32 127, %v487_v3 }
  0x2b   :  { %634 = vmatprep.subr.bf16.mxu0 %v749_v0  ;;  %639 = vmatpush3.bf16.msra.mxu1 %v638_v10  ;;  %v644_v17 = vpack.c.bf16 %v226_v16, %v225_v15  ;;  %v228_v25 = vld [vmem:[#allocation6 + $0x58] sm:$0xff]  ;;  %v311_v27 = vld [vmem:[#allocation6 + $0x60] sm:$0xff]  ;;  %v312_v28 = vld [vmem:[#allocation6 + $0x68] sm:$0xff] }
  0x2c   :  { %640 = vmatprep.subr.bf16.mxu1 %v749_v0  ;;  %v647_v26 = vpack.c.bf16 %v228_v25, %v227_v24  ;;  %v650_v29 = vpack.c.bf16 %v312_v28, %v311_v27  ;;  %v539_v30 = vld [vmem:[%s869_s3 + $0x1] ss:$0 sm:$0xff]  ;;  %v313_v36 = vld [vmem:[#allocation6 + $0x70] sm:$0xff]  ;;  %v542_v39 = vld [vmem:[%s869_s3 + $0x2] ss:$0 sm:$0xff]  ;;  %vm506_vm7 = vcmp.lt.s32.totalorder %v488_v7, 16 }
  0x2d   :  { %v314_v37 = vld [vmem:[#allocation6 + $0x78] sm:$0xff]  ;;  %v402_v43 = vld [vmem:[#allocation6 + $0x80] sm:$0xff]  ;;  %v403_v44 = vld [vmem:[#allocation6 + $0x88] sm:$0xff]  ;;  %vm505_vm8 = vcmp.lt.s32.totalorder %v488_v7, 8  ;;  %vm517_vm10 = vcmp.eq.s32.totalorder %v488_v7, 17 }
  0x2e   :  { %636 = vmatpush3.bf16.msra.mxu0 %v635_v9  ;;  %v653_v38 = vpack.c.bf16 %v314_v37, %v313_v36  ;;  %v656_v45 = vpack.c.bf16 %v403_v44, %v402_v43  ;;  %v404_v46 = vld [vmem:[#allocation6 + $0x90] sm:$0xff]  ;;  %v405_v47 = vld [vmem:[#allocation6 + $0x98] sm:$0xff] }
  0x2f   :  { %643 = vmatprep.subr.bf16.mxu0 %v749_v0  ;;  %642 = vmatpush3.bf16.msra.mxu1 %v641_v14  ;;  %v659_v48 = vpack.c.bf16 %v405_v47, %v404_v46  ;;  %v545_v49 = vld [vmem:[%s869_s3 + $0x3] ss:$0 sm:$0xff]  ;;  %v548_v10 = vld [vmem:[%s869_s3 + $0x4] ss:$0 sm:$0xff]  ;;  %s717_s3 = scalar_lea.vmem %s527_s25, 128 }
  0x30   :  { %649 = vmatprep.subr.bf16.mxu1 %v749_v0  ;;  %p718_p2 = scmp.ne.s32.totalorder %s527_s25, %s717_s3  ;;  %p723_p4 = scmp.lt.s32.totalorder %s717_s3, %s717_s3 }
  0x31   :  { %585 = vmatmul.mubr.msk.f32.vlgmr.msra.gmra.mrb[0].mxu0 %vm58_vm1, %v45_v11 }
  0x32   :  { %606 = vmatprep.mubr.msk.f32.mxu0 %vm750_vm0, %v751_v1  ;;  %645 = vmatpush3.bf16.msra.mxu0 %v644_v17  ;;  %p724_p5 = por %p723_p4, %p722_p3 }
  0x33   :  { %646 = vmatprep.subr.bf16.mxu0 %v749_v0 }
  0x34   :  { %p725_p6 = pnand %p724_p5, %p718_p2 }
  0x36   :  { %648 = vmatpush3.bf16.msra.mxu0 %v647_v26 }
  0x37   :  { %655 = vmatprep.subr.bf16.mxu0 %v749_v0 }
 0x104   :  { %v128_v19 = vpop.f32.mrb[0].mxu0 }
 0x105   :  { %v129_v20 = vadd.f32 %v536_v18, %v128_v19  ;;  %v586_v21 = vpop.f32.mrb[1].mxu0 }
 0x107   :  { %vm132_vm2 = vcmp.gt.f32.partialorder %v129_v20, 0.0  ;;  %v133_v22 = vmul.f32 0.01, %v129_v20 }
 0x109   :  { %v134_v23 = vsel %vm132_vm2, %v129_v20, %v133_v22 }
 0x10a   :  { %596 = vmatmul.mubr.msk.f32.vlgmr.msra.gmra.mrb[0].mxu1 %vm58_vm1, %v134_v23 }
 0x10b   :  { %617 = vmatprep.mubr.msk.f32.mxu1 %vm750_vm0, %v751_v1  ;;  %651 = vmatpush3.bf16.msra.mxu1 %v650_v29 }
 0x10c   :  { %652 = vmatprep.subr.bf16.mxu1 %v749_v0 }
 0x10f   :  { %654 = vmatpush3.bf16.msra.mxu1 %v653_v38 }
 0x1dd   :  { %v217_v31 = vpop.f32.mrb[0].mxu1 }
 0x1de   :  { %v218_v32 = vadd.f32 %v539_v30, %v217_v31  ;;  %v597_v33 = vpop.f32.mrb[1].mxu1 }
 0x1e0   :  { %vm221_vm3 = vcmp.gt.f32.partialorder %v218_v32, 0.0  ;;  %v222_v34 = vmul.f32 0.01, %v218_v32 }
 0x1e2   :  { %v223_v35 = vsel %vm221_vm3, %v218_v32, %v222_v34 }
 0x1e3   :  { %607 = vmatmul.mubr.msk.f32.vlgmr.msra.gmra.mrb[2].mxu0 %vm58_vm1, %v223_v35 }
 0x1e4   :  { %628 = vmatprep.mubr.msk.f32.mxu0 %vm750_vm0, %v751_v1  ;;  %657 = vmatpush3.bf16.msra.mxu0 %v656_v45 }
 0x1e5   :  { %658 = vmatprep.subr.bf16.mxu0 %v749_v0 }
 0x1e8   :  { %660 = vmatpush3.bf16.msra.mxu0 %v659_v48 }
 0x2b6   :  { %v306_v40 = vpop.f32.mrb[2].mxu0 }
 0x2b7   :  { %v307_v41 = vadd.f32 %v542_v39, %v306_v40  ;;  %v608_v42 = vpop.f32.mrb[3].mxu0 }
 0x2b9   :  { %618 = vmatmul.mubr.msk.f32.vlgmr.msra.gmra.mrb[2].mxu1 %vm58_vm1, %v307_v41  ;;  %v490_v58 = vsub.f32 %v307_v41, %v489_v57 }
 0x2bb   :  { %v492_v59 = vmin.f32 %v490_v58, 20.0  ;;  %vm491_vm6 = vcmp.gt.f32.partialorder %v490_v58, 20.0 }
 0x2bd   :  { %v493_v60 = vmul.f32 1.442695, %v492_v59 }
 0x2bf   :  { %669 = vpow2.f32 %v493_v60 }
 0x2c9   :  { %v670_v61 = vpop.eup %669 }
 0x2ca   :  { %v495_v62 = vadd.f32 1.0, %v670_v61  ;;  %v498_v63 = vmul.f32 -0.5, %v670_v61  ;;  %v501_v4 = vand.u32 2147483647, %v670_v61 }
 0x2cc   :  { %671 = vlog2.f32 %v495_v62  ;;  %v499_v2 = vadd.f32 1.0, %v498_v63  ;;  %vm502_vm5 = vcmp.lt.f32.partialorder %v501_v4, 0.0004427343 }
 0x2ce   :  { %v500_v6 = vmul.f32 %v670_v61, %v499_v2 }
 0x2d6   :  { %v672_v0 = vpop.eup %671 }
 0x2d7   :  { %v497_v5 = vmul.f32 0.6931472, %v672_v0 }
 0x2d9   :  { %v503_v8 = vsel %vm502_vm5, %v500_v6, %v497_v5 }
 0x2da   :  { %v504_v9 = vsel %vm491_vm6, %v490_v58, %v503_v8 }
 0x2db   :  { %v507_v11 = vsel %vm506_vm7, %v504_v9, 0.0 }
 0x2dc   :  { %v508_v15 = vsel %vm505_vm8, %v307_v41, %v507_v11 }
 0x38c   :  { %v392_v50 = vpop.f32.mrb[2].mxu1 }
 0x38d   :  { %v393_v51 = vadd.f32 %v545_v49, %v392_v50  ;;  %v619_v52 = vpop.f32.mrb[3].mxu1 }
 0x38f   :  { %vm396_vm4 = vcmp.gt.f32.partialorder %v393_v51, 0.0  ;;  %v397_v53 = vmul.f32 0.01, %v393_v51 }
 0x391   :  { %v398_v54 = vsel %vm396_vm4, %v393_v51, %v397_v53 }
 0x392   :  { %v399_v55 = vadd.f32 %v398_v54, %v223_v35 }
 0x394   :  { %v400_v56 = vmax.f32 %v399_v55, 0.0 }
 0x396   :  { %629 = vmatmul.mubr.msk.f32.vlgmr.msra.gmra.mrb[4].mxu0 %vm58_vm1, %v400_v56 }
 0x469   :  { %v483_v12 = vpop.f32.mrb[4].mxu0 }
 0x46a   :  { %v484_v13 = vadd.f32 %v548_v10, %v483_v12  ;;  %v630_v14 = vpop.f32.mrb[5].mxu0 }
 0x46c   :  { %v509_v16 = vadd.f32 %v508_v15, %v484_v13 }
 0x46e   :  { %vm510_vm9 = vcmp.ne.f32.partialorder %v509_v16, %v509_v16 }
 0x46f   :  { %v511_v17 = vsel %vm510_vm9, 1.0, %v751_v1 }
 0x470   :  { %512 = vmax.xlane.f32.xlu0 %v511_v17 }
 0x4fd   :  { %v513_v18 = vpop.xlane.xlu0 %512 }
 0x4fe   :  { %vm514_vm11 = vcmp.gt.f32.partialorder %v513_v18, 0.0 }
 0x4ff   :  { %v550_v19 = vsel %vm514_vm11, 1.0, %v751_v1 }
 0x500   :  { %v518_v20 = vsel %vm517_vm10, %v550_v19, %v509_v16 }
 0x501   :  { %519 = vst [vmem:[#allocation8] sm:$0xff] %v518_v20 }
 0x502   :  { %728 = shalt.err (!%p725_p6)
}
 0x503   :  { %s729_s28 = scalar_lea.hbm %s870_s4, 128 }
 0x504   :  { %p730_p7 = scmp.ne.s32.totalorder %s870_s4, %s729_s28  ;;  %p733_p8 = scmp.lt.u32.totalorder %s729_s28, %s870_s4 }
 0x506   :  { %p735_p9 = pnand %p733_p8, %p730_p7 }
 0x508   :  { %738 = shalt.err (!%p735_p9)
}
 0x509   :  { %529 = dma.vmem_to_hbm [thread:$0]  %s527_s25, 128, %s870_s4, [#allocation5]  }
 0x50a   :  { %743 = dma.done.wait [#allocation5], 128  }
 0x50b   :  { %744 = vsyncadd [#allocation5], 4294967168 }
 0x50c   :  { %533 = vsyncpa [#allocation4], 1 }
 0x50d   :  { %534 = vsyncpa [#allocation7], 1 }
 0x50e   :  { %535 = vsyncpa [#allocation5], 1 }

</bundles_post_ra>
